<compile_context>
chip_gen: v5e
topology: v5e:2x2
jax: 0.10.0
libtpu: 0.0.40
codegen_flags: <defaults>
</compile_context>

<pallas_src>
import functools

import jax
import jax.numpy as jnp
from jax.experimental import pallas as pl
from jax.experimental.pallas import tpu as pltpu


def _round_up(x, n):
    return ((x + n - 1) // n) * n


def _ffn_kernel(x_ref, w1_ref, b1_ref, w2_ref, b2_ref, o_ref, acc_ref):
    # x_ref:   (tm, d_model)   bf16
    # w1_ref:  (d_model, tf)   bf16     b1_ref: (1, tf)       f32
    # w2_ref:  (tf, d_model)   bf16     b2_ref: (1, d_model)  f32
    # o_ref:   (tm, d_model)   output dtype
    # acc_ref: (tm, d_model)   f32 scratch, resident across the d_ff axis
    j = pl.program_id(1)

    @pl.when(j == 0)
    def _init():
        acc_ref[...] = jnp.zeros_like(acc_ref)

    # h_j = relu(x @ W1_j + b1_j)  -- bf16 operands, f32 MXU accumulation.
    h = jnp.dot(x_ref[...], w1_ref[...], preferred_element_type=jnp.float32)
    h = jnp.maximum(h + b1_ref[...], 0.0)

    # acc += h_j @ W2_j
    acc_ref[...] += jnp.dot(h.astype(w2_ref.dtype), w2_ref[...],
                            preferred_element_type=jnp.float32)

    # Finalize: add b2 once per output tile, cast, store.
    @pl.when(j == pl.num_programs(1) - 1)
    def _finalize():
        o_ref[...] = (acc_ref[...] + b2_ref[...]).astype(o_ref.dtype)


@functools.partial(jax.jit, static_argnames=("block_m", "block_ff"))
def position_wise_feed_forward(x, w1, b1, w2, b2, *, block_m=256, block_ff=512):
    """FFN forward: relu(x @ w1 + b1) @ w2 + b2.

    x: (..., d_model); w1: (d_model, d_ff); b1: (d_ff,);
    w2: (d_ff, d_model); b2: (d_model,).
    """
    orig_shape = x.shape
    out_dtype = x.dtype
    d_model = orig_shape[-1]
    d_ff = w1.shape[-1]

    x2d = x.reshape(-1, d_model)
    m = x2d.shape[0]

    # --- M tiling: pad M up to a multiple of the row tile (keep fast path).
    tm = min(block_m, _round_up(m, 8))
    m_pad = _round_up(m, tm)
    if m_pad != m:
        x2d = jnp.pad(x2d, ((0, m_pad - m), (0, 0)))

    # --- d_ff tiling (reduction axis). tf must be a multiple of 128 (or d_ff).
    tf = d_ff
    for cand in (block_ff, 256, 128):
        if cand <= d_ff and d_ff % cand == 0:
            tf = cand
            break
    n_ff = d_ff // tf

    # bf16 operands for the MXU; biases and accumulator stay f32.
    compute_dtype = jnp.bfloat16
    x2d = x2d.astype(compute_dtype)
    w1c = w1.astype(compute_dtype)
    w2c = w2.astype(compute_dtype)
    b1_2d = b1.reshape(1, d_ff).astype(jnp.float32)
    b2_2d = b2.reshape(1, d_model).astype(jnp.float32)

    # Explicit VMEM budget: double-buffered tiles + f32 accumulator + headroom.
    def _bytes(shape, dt):
        n = 1
        for s in shape:
            n *= s
        return n * jnp.dtype(dt).itemsize

    tile_bytes = (
        2 * _bytes((tm, d_model), compute_dtype)        # x tile
        + 2 * _bytes((d_model, tf), compute_dtype)      # W1 tile
        + 2 * _bytes((tf, d_model), compute_dtype)      # W2 tile
        + 2 * _bytes((1, tf), jnp.float32)              # b1 tile
        + 2 * _bytes((1, d_model), jnp.float32)         # b2 tile
        + 2 * _bytes((tm, d_model), out_dtype)          # out tile
        + _bytes((tm, d_model), jnp.float32)            # accumulator scratch
    )
    vmem_limit = min(max(tile_bytes + (16 << 20), 32 << 20), 64 << 20)

    out = pl.pallas_call(
        _ffn_kernel,
        out_shape=jax.ShapeDtypeStruct((m_pad, d_model), out_dtype),
        grid_spec=pltpu.PrefetchScalarGridSpec(
            num_scalar_prefetch=0,
            grid=(m_pad // tm, n_ff),
            in_specs=[
                pl.BlockSpec((tm, d_model), lambda i, j: (i, 0)),
                pl.BlockSpec((d_model, tf), lambda i, j: (0, j)),
                pl.BlockSpec((1, tf), lambda i, j: (0, j)),
                pl.BlockSpec((tf, d_model), lambda i, j: (j, 0)),
                pl.BlockSpec((1, d_model), lambda i, j: (0, 0)),
            ],
            out_specs=pl.BlockSpec((tm, d_model), lambda i, j: (i, 0)),
            scratch_shapes=[pltpu.VMEM((tm, d_model), jnp.float32)],
        ),
        compiler_params=pltpu.CompilerParams(
            dimension_semantics=("parallel", "arbitrary"),
            vmem_limit_bytes=vmem_limit,
        ),
    )(x2d, w1c, b1_2d, w2c, b2_2d)

    if m_pad != m:
        out = out[:m]
    return out.reshape(orig_shape)


def _reference(x, w1, b1, w2, b2):
    h = jnp.maximum(x @ w1 + b1, 0.0)
    return h @ w2 + b2


if __name__ == "__main__":
    key = jax.random.PRNGKey(0)

    def _run_case(batch, seq, d_model):
        d_ff = 4 * d_model
        kx, kw1, kb1, kw2, kb2 = jax.random.split(
            jax.random.fold_in(key, batch * 1000 + seq), 5)

        x = jax.random.normal(kx, (batch, seq, d_model), dtype=jnp.float32)
        # nn.Linear(d_model, 4*d_model).weight is (d_ff, d_model); we store the
        # transpose (d_model, d_ff) so the kernel computes x @ w1 directly.
        w1 = jax.random.normal(kw1, (d_model, d_ff), dtype=jnp.float32) * 0.1
        b1 = jax.random.normal(kb1, (d_ff,), dtype=jnp.float32) * 0.1
        w2 = jax.random.normal(kw2, (d_ff, d_model), dtype=jnp.float32) * 0.1
        b2 = jax.random.normal(kb2, (d_model,), dtype=jnp.float32) * 0.1

        y = position_wise_feed_forward(x, w1, b1, w2, b2)
        y = jax.block_until_ready(y)

        y_ref = _reference(x, w1, b1, w2, b2)
        assert y.shape == x.shape
        # bf16 compute path vs f32 reference -> loosened tolerance.
        assert jnp.allclose(y, y_ref, atol=2e-2, rtol=2e-2), (
            "mismatch vs reference", float(jnp.max(jnp.abs(y - y_ref))))

    # Small canonical case (d_ff=128 -> single reduction step).
    _run_case(batch=2, seq=8, d_model=32)
    # Case exercising M padding (batch*seq = 15 -> padded to 16).
    _run_case(batch=3, seq=5, d_model=32)

    print("KERNEL_OK")
</pallas_src>

<mosaic_0001>
module attributes {stable_mosaic.version = 11 : i64} {
  func.func @_ffn_kernel(%arg0: i32, %arg1: i32, %arg2: memref<16x32xbf16, #tpu.memory_space<vmem>>, %arg3: memref<32x128xbf16, #tpu.memory_space<vmem>>, %arg4: memref<1x128xf32, #tpu.memory_space<vmem>>, %arg5: memref<128x32xbf16, #tpu.memory_space<vmem>>, %arg6: memref<1x32xf32, #tpu.memory_space<vmem>>, %arg7: memref<16x32xf32, #tpu.memory_space<vmem>>, %arg8: memref<16x32xf32, #tpu.memory_space<vmem>>) attributes {dimension_semantics = [#tpu.dimension_semantics<parallel>, #tpu.dimension_semantics<arbitrary>], iteration_bounds = array<i64: 1, 1>, scalar_prefetch = 0 : i64, scratch_operands = 1 : i64, tpu.core_type = #tpu.core_type<tc>, window_params = [{transform_indices = @transform_0, window_bounds = array<i64: 16, 32>}, {transform_indices = @transform_1, window_bounds = array<i64: 32, 128>}, {transform_indices = @transform_2, window_bounds = array<i64: 1, 128>}, {transform_indices = @transform_3, window_bounds = array<i64: 128, 32>}, {pipeline_mode = #tpu.pipeline_mode<synchronous>, transform_indices = @transform_4, window_bounds = array<i64: 1, 32>}, {transform_indices = @transform_5, window_bounds = array<i64: 16, 32>}]} {
    %c0_i32 = arith.constant 0 : i32
    %0 = arith.cmpi eq, %arg1, %c0_i32 : i32
    %1 = arith.extui %0 : i1 to i32
    %c0_i32_0 = arith.constant 0 : i32
    %2 = arith.cmpi ne, %1, %c0_i32_0 : i32
    scf.if %2 {
      %cst_16 = arith.constant 0.000000e+00 : f32
      %20 = vector.broadcast %cst_16 : f32 to vector<16x32xf32>
      %c0_17 = arith.constant 0 : index
      %c0_18 = arith.constant 0 : index
      %21 = vector.load %arg8[%c0_17, %c0_18] : memref<16x32xf32, #tpu.memory_space<vmem>>, vector<16x32xf32>
      tpu.vector_store %arg8[%c0_17, %c0_18], %20 {strides = array<i32>} : memref<16x32xf32, #tpu.memory_space<vmem>>, vector<16x32xf32>,
    } else {
    }
    %c0 = arith.constant 0 : index
    %c0_1 = arith.constant 0 : index
    %3 = vector.load %arg2[%c0, %c0_1] : memref<16x32xbf16, #tpu.memory_space<vmem>>, vector<16x32xbf16>
    %c0_2 = arith.constant 0 : index
    %c0_3 = arith.constant 0 : index
    %4 = vector.load %arg3[%c0_2, %c0_3] : memref<32x128xbf16, #tpu.memory_space<vmem>>, vector<32x128xbf16>
    %cst = arith.constant dense<0.000000e+00> : vector<16x128xf32>
    %5 = tpu.matmul %3, %4, %cst {dimension_numbers = #tpu.dot_dimension_numbers<[1], [0], [0], [1], [0, 0, 1, 1], [], []>} : vector<16x32xbf16>, vector<32x128xbf16>, vector<16x128xf32> -> vector<16x128xf32>
    %c0_4 = arith.constant 0 : index
    %c0_5 = arith.constant 0 : index
    %6 = vector.load %arg4[%c0_4, %c0_5] : memref<1x128xf32, #tpu.memory_space<vmem>>, vector<1x128xf32>
    %7 = vector.broadcast %6 : vector<1x128xf32> to vector<16x128xf32>
    %8 = arith.addf %5, %7 : vector<16x128xf32>
    %cst_6 = arith.constant 0.000000e+00 : f32
    %9 = vector.broadcast %cst_6 : f32 to vector<16x128xf32>
    %10 = arith.maximumf %8, %9 : vector<16x128xf32>
    %c0_7 = arith.constant 0 : index
    %c0_8 = arith.constant 0 : index
    %11 = vector.load %arg8[%c0_7, %c0_8] : memref<16x32xf32, #tpu.memory_space<vmem>>, vector<16x32xf32>
    %12 = arith.truncf %10 : vector<16x128xf32> to vector<16x128xbf16>
    %c0_9 = arith.constant 0 : index
    %c0_10 = arith.constant 0 : index
    %13 = vector.load %arg5[%c0_9, %c0_10] : memref<128x32xbf16, #tpu.memory_space<vmem>>, vector<128x32xbf16>
    %cst_11 = arith.constant dense<0.000000e+00> : vector<16x32xf32>
    %14 = tpu.matmul %12, %13, %cst_11 {dimension_numbers = #tpu.dot_dimension_numbers<[1], [0], [0], [1], [0, 0, 1, 1], [], []>} : vector<16x128xbf16>, vector<128x32xbf16>, vector<16x32xf32> -> vector<16x32xf32>
    %15 = arith.addf %11, %14 : vector<16x32xf32>
    %c0_12 = arith.constant 0 : index
    %c0_13 = arith.constant 0 : index
    %16 = vector.load %arg8[%c0_12, %c0_13] : memref<16x32xf32, #tpu.memory_space<vmem>>, vector<16x32xf32>
    tpu.vector_store %arg8[%c0_12, %c0_13], %15 {strides = array<i32>} : memref<16x32xf32, #tpu.memory_space<vmem>>, vector<16x32xf32>,
    %c0_i32_14 = arith.constant 0 : i32
    %17 = arith.cmpi eq, %arg1, %c0_i32_14 : i32
    %18 = arith.extui %17 : i1 to i32
    %c0_i32_15 = arith.constant 0 : i32
    %19 = arith.cmpi ne, %18, %c0_i32_15 : i32
    scf.if %19 {
      %c0_16 = arith.constant 0 : index
      %c0_17 = arith.constant 0 : index
      %20 = vector.load %arg8[%c0_16, %c0_17] : memref<16x32xf32, #tpu.memory_space<vmem>>, vector<16x32xf32>
      %c0_18 = arith.constant 0 : index
      %c0_19 = arith.constant 0 : index
      %21 = vector.load %arg6[%c0_18, %c0_19] : memref<1x32xf32, #tpu.memory_space<vmem>>, vector<1x32xf32>
      %22 = vector.broadcast %21 : vector<1x32xf32> to vector<16x32xf32>
      %23 = arith.addf %20, %22 : vector<16x32xf32>
      %c0_20 = arith.constant 0 : index
      %c0_21 = arith.constant 0 : index
      %24 = vector.load %arg7[%c0_20, %c0_21] : memref<16x32xf32, #tpu.memory_space<vmem>>, vector<16x32xf32>
      tpu.vector_store %arg7[%c0_20, %c0_21], %23 {strides = array<i32>} : memref<16x32xf32, #tpu.memory_space<vmem>>, vector<16x32xf32>,
    } else {
    }
    return
  }
  func.func @transform_0(%arg0: i32, %arg1: i32) -> (i32, i32) {
    %c0_i32 = arith.constant 0 : i32
    %c0_i32_0 = arith.constant 0 : i32
    return %arg0, %c0_i32 : i32, i32
  }
  func.func @transform_1(%arg0: i32, %arg1: i32) -> (i32, i32) {
    %c0_i32 = arith.constant 0 : i32
    %c0_i32_0 = arith.constant 0 : i32
    return %c0_i32, %arg1 : i32, i32
  }
  func.func @transform_2(%arg0: i32, %arg1: i32) -> (i32, i32) {
    %c0_i32 = arith.constant 0 : i32
    %c0_i32_0 = arith.constant 0 : i32
    return %c0_i32, %arg1 : i32, i32
  }
  func.func @transform_3(%arg0: i32, %arg1: i32) -> (i32, i32) {
    %c0_i32 = arith.constant 0 : i32
    %c0_i32_0 = arith.constant 0 : i32
    return %arg1, %c0_i32 : i32, i32
  }
  func.func @transform_4(%arg0: i32, %arg1: i32) -> (i32, i32) {
    %c0_i32 = arith.constant 0 : i32
    %c0_i32_0 = arith.constant 0 : i32
    %c0_i32_1 = arith.constant 0 : i32
    return %c0_i32, %c0_i32_0 : i32, i32
  }
  func.func @transform_5(%arg0: i32, %arg1: i32) -> (i32, i32) {
    %c0_i32 = arith.constant 0 : i32
    %c0_i32_0 = arith.constant 0 : i32
    return %arg0, %c0_i32 : i32, i32
  }
}

</mosaic_0001>

<bundles_post_ra>
// kernel: position_wise_feed_forward.1
= control target key start
LH: loop header
LB: loop body
LE: loop exit
PB: predicated region body
PF: predicated region fallthrough
CT: control target
= control target key end

     0   :  { %s363_s0 = inlined_call_operand.vmem [shape: bf16[16,32], index: 0, kind: input, shape index: {}]   ;;  %s364_s1 = inlined_call_operand.vmem [shape: bf16[32,128], index: 1, kind: input, shape index: {}]   ;;  %s365_s2 = inlined_call_operand.vmem [shape: f32[1,128], index: 2, kind: input, shape index: {}]   ;;  %s366_s3 = inlined_call_operand.vmem [shape: bf16[128,32], index: 3, kind: input, shape index: {}]   ;;  %s367_s4 = inlined_call_operand.vmem [shape: f32[1,32], index: 4, kind: input, shape index: {}]   ;;  %s368_s5 = inlined_call_operand.hbm [shape: f32[16,32], index: 5, kind: output, shape index: {}]  }
   0x1   :  { %v239_v0 = vld [vmem:[%s364_s1 + $0x8] sm:$0xff]  ;;  %v247_v1 = vld [vmem:[%s366_s3 + $0x38] sm:$0xff]  ;;  %v238_v2 = vld [vmem:[%s364_s1] sm:$0xff] }
   0x2   :  { %66 = vmatpush.bf16.msra.mxu0 %v239_v0  ;;  %143 = vmatpush.bf16.msra.mxu1 %v247_v1  ;;  %v246_v3 = vld [vmem:[%s366_s3 + $0x30] sm:$0xff] }
   0x3   :  { %10 = vsyncpa [#allocation4], 0  ;;  %v237_v4 = vld [vmem:[%s363_s0] sm:$0xff]  ;;  %vm26_vm0 = vcmask 261120   ;;  %v245_v5 = vld [vmem:[%s366_s3 + $0x28] sm:$0xff]  ;;  %v280_v11 = vmov 0.0  }
   0x4   :  { %v244_v6 = vld [vmem:[%s366_s3 + $0x20] sm:$0xff]  ;;  %v243_v7 = vld [vmem:[%s366_s3 + $0x18] sm:$0xff]  ;;  %v242_v8 = vld [vmem:[%s366_s3 + $0x10] sm:$0xff]  ;;  %27 = vst.msk [vmem:[#allocation2] sm:$0xff] %vm26_vm0, %v280_v11  ;;  %s180_s19 = sshll.u32 %s368_s5, 4  ;;  %s283_s20 = smov 8   ;;  %s181_s19 = int_to_ptr.hbm [resolvable:$true] %s180_s19 }
   0x5   :  { %v241_v9 = vld [vmem:[%s366_s3 + $0x8] sm:$0xff]  ;;  %v240_v10 = vld [vmem:[%s366_s3] sm:$0xff]  ;;  %28 = vst.msk [vmem:[#allocation2 + $0x8] sm:$0xff] %vm26_vm0, %v280_v11 }
   0x6   :  { %67 = vmatpush.bf16.msra.mxu0 %v238_v2  ;;  %144 = vmatpush.bf16.msra.mxu1 %v246_v3  ;;  %v252_v13 = vld [vmem:[%s365_s2] ss:$0 sm:$0xff]  ;;  %s281_s2 = smov [#allocation3]  }
   0x7   :  { %v253_v24 = vld [vmem:[%s367_s4] ss:$0 sm:$0xff]  ;;  %s178_s16 = sshll.u32 %s281_s2, 4  ;;  %s282_s4 = smov 128   ;;  %s179_s16 = int_to_ptr.vmem [resolvable:$true] %s178_s16 }
   0x9   :  { %204 = vmatmul.msk.bf16.vlgmr.msra.gmra.mxu0 %vm26_vm0, %v237_v4 }
   0xa   :  { %145 = vmatpush.bf16.msra.mxu1 %v245_v5 }
   0xb   :  { %v76_v20 = vld [vmem:[#allocation2] sm:$0xff] }
   0xc   :  { %v77_v23 = vld [vmem:[#allocation2 + $0x8] sm:$0xff] }
   0xe   :  { %146 = vmatpush.bf16.msra.mxu1 %v244_v6 }
  0x12   :  { %147 = vmatpush.bf16.msra.mxu1 %v243_v7 }
  0x16   :  { %148 = vmatpush.bf16.msra.mxu1 %v242_v8 }
  0x1a   :  { %149 = vmatpush.bf16.msra.mxu1 %v241_v9 }
  0x1e   :  { %150 = vmatpush.bf16.msra.mxu1 %v240_v10 }
  0x86   :  { %v69_v12 = vpop.f32.mrf.mxu0 }
  0x87   :  { %v70_v14 = vadd.f32 %v252_v13, %v69_v12 }
  0x89   :  { %v74_v17 = vmax.f32 %v70_v14, 0.0 }
  0x8e   :  { %v71_v15 = vpop.f32.mrf.mxu0 }
  0x8f   :  { %v72_v16 = vadd.f32 %v252_v13, %v71_v15 }
  0x91   :  { %v75_v18 = vmax.f32 %v72_v16, 0.0 }
  0x93   :  { %v78_v19 = vpack.c.bf16 %v75_v18, %v74_v17 }
  0x95   :  { %151 = vmatmul.bf16.vlgmr.msra.gmra.mxu1 %v78_v19 }
 0x112   :  { %v152_v21 = vpop.f32.mrf.mxu1 }
 0x113   :  { %v157_v22 = vadd.f32 %v152_v21, %v76_v20 }
 0x115   :  { %159 = vst.msk [vmem:[#allocation2] sm:$0xff] %vm26_vm0, %v157_v22 }
 0x11a   :  { %v154_v25 = vpop.f32.mrf.mxu1 }
 0x11b   :  { %v158_v26 = vadd.f32 %v154_v25, %v77_v23 }
 0x11c   :  { %v164_v27 = vld [vmem:[#allocation2] sm:$0xff] }
 0x11d   :  { %160 = vst.msk [vmem:[#allocation2 + $0x8] sm:$0xff] %vm26_vm0, %v158_v26  ;;  %v170_v28 = vadd.f32 %v253_v24, %v164_v27 }
 0x11f   :  { %172 = vst.msk [vmem:[#allocation3] sm:$0xff] %vm26_vm0, %v170_v28 }
 0x124   :  { %v165_v29 = vld [vmem:[#allocation2 + $0x8] sm:$0xff] }
 0x125   :  { %v171_v30 = vadd.f32 %v253_v24, %v165_v29 }
 0x127   :  { %173 = vst.msk [vmem:[#allocation3 + $0x8] sm:$0xff] %vm26_vm0, %v171_v30 }
 0x128   :  { %186 = dma.vmem_to_hbm [thread:$0]  %s179_s16, 256, %s181_s19, [#allocation4], %s282_s4, %s282_s4, %s283_s20  }
 0x129   :  { %278 = dma.done.wait [#allocation4], 256  }
 0x12a   :  { %279 = vsyncadd [#allocation4], 4294967040 }
 0x12b   :  { %191 = vsyncpa [#allocation4], 1 }

</bundles_post_ra>
